<compile_context>
chip_gen: v5e
topology: v5e:2x2
jax: 0.10.0
libtpu: 0.0.40
codegen_flags: <defaults>
</compile_context>

<pallas_src>
import functools

import jax
import jax.numpy as jnp
from jax import lax
from jax.experimental import pallas as pl
from jax.experimental.pallas import tpu as pltpu

N_EMBED = 32
HIDDEN = 4 * N_EMBED            # 128
GROUP = 4                       # tokens packed per 128-lane row (128 // 32)
DROPOUT_P = 0.1
_KEEP_SCALE = 1.0 / (1.0 - DROPOUT_P)
_DROP_THRESH = int(round(DROPOUT_P * (1 << 31)))    # compare in [0, 2^31)


def _round_up(x, m):
    return (x + m - 1) // m * m


def _lsr(x, k):
    # Logical shift right for int32: arithmetic shift + mask kills sign bits.
    return (x >> k) & jnp.int32((1 << (32 - k)) - 1)


def _hash_bits(idx, seed):
    # murmur3 fmix32 over (element index, seed); wrapping int32 arithmetic.
    x = idx ^ (seed * jnp.int32(-1640531527))        # 0x9E3779B9
    x = x ^ _lsr(x, 16)
    x = x * jnp.int32(-2048144789)                   # 0x85EBCA6B
    x = x ^ _lsr(x, 13)
    x = x * jnp.int32(-1028477387)                   # 0xC2B2AE35
    x = x ^ _lsr(x, 16)
    return x & jnp.int32(0x7FFFFFFF)                 # uniform in [0, 2^31)


def ffn_kernel(seed_ref, x_ref, w1_ref, b1_ref, w2_ref, b2_ref, o_ref, *,
               tile_g: int, training: bool):
    # Two MXU matmuls + ReLU (+ dropout), all in VMEM, lane-dense layout.
    x = x_ref[...]                                                  # (tg, 128)
    h = jnp.dot(x, w1_ref[...], preferred_element_type=jnp.float32) + b1_ref[...]
    h = jnp.maximum(h, 0.0)                                         # ReLU
    y = jnp.dot(h, w2_ref[...], preferred_element_type=jnp.float32) + b2_ref[...]
    if training:
        row0 = pl.program_id(0) * tile_g                 # global grouped row
        rows = lax.broadcasted_iota(jnp.int32, y.shape, 0) + row0
        cols = lax.broadcasted_iota(jnp.int32, y.shape, 1)
        idx = rows * jnp.int32(y.shape[1]) + cols        # global element index
        r = _hash_bits(idx, seed_ref[0])
        keep = r >= jnp.int32(_DROP_THRESH)              # int threshold compare
        y = jnp.where(keep, y * _KEEP_SCALE, 0.0)
    o_ref[...] = y.astype(o_ref.dtype)


def init_params(key, n_embed=N_EMBED, hidden=HIDDEN, dtype=jnp.float32):
    """Deterministic init matching PyTorch nn.Linear's U(-1/sqrt(fan_in), .)."""
    k1, k2, k3, k4 = jax.random.split(key, 4)
    bound1 = 1.0 / (n_embed ** 0.5)
    bound2 = 1.0 / (hidden ** 0.5)
    w1 = jax.random.uniform(k1, (n_embed, hidden), dtype, -bound1, bound1)
    b1 = jax.random.uniform(k2, (1, hidden), dtype, -bound1, bound1)
    w2 = jax.random.uniform(k3, (hidden, n_embed), dtype, -bound2, bound2)
    b2 = jax.random.uniform(k4, (1, n_embed), dtype, -bound2, bound2)
    return w1, b1, w2, b2


def _group_params(params):
    """Block-diagonal weights / tiled biases for the 4-tokens-per-row layout."""
    w1, b1, w2, b2 = params
    eye = jnp.eye(GROUP, dtype=w1.dtype)
    w1g = jnp.kron(eye, w1)              # (128, 512) block-diagonal
    w2g = jnp.kron(eye, w2)              # (512, 128) block-diagonal
    b1g = jnp.tile(b1, (1, GROUP))       # (1, 512)
    b2g = jnp.tile(b2, (1, GROUP))       # (1, 128)
    return w1g, b1g, w2g, b2g


def feed_forward(x, params, *, seed=0, training=True, tile_g_max=1024):
    B, T, E = x.shape
    assert E == N_EMBED
    M = B * T

    # Grouped (lane-dense) row count and tiling.
    G = pl.cdiv(M, GROUP)
    tile_g = min(tile_g_max, _round_up(G, 8))
    G_pad = _round_up(G, tile_g)
    M_pad = G_pad * GROUP

    x2 = x.reshape(M, E)
    if M_pad != M:
        x2 = jnp.pad(x2, ((0, M_pad - M), (0, 0)))
    xg = x2.reshape(G_pad, GROUP * E)        # row-major pack: 4 tokens per row

    w1g, b1g, w2g, b2g = _group_params(params)
    seed_arr = jnp.array([seed], dtype=jnp.int32)

    GE = GROUP * E          # 128
    GH = GROUP * HIDDEN     # 512

    out = pl.pallas_call(
        functools.partial(ffn_kernel, tile_g=tile_g, training=training),
        out_shape=jax.ShapeDtypeStruct((G_pad, GE), x.dtype),
        grid_spec=pltpu.PrefetchScalarGridSpec(
            num_scalar_prefetch=1,                  # dropout seed lands in SMEM
            grid=(G_pad // tile_g,),
            in_specs=[
                pl.BlockSpec((tile_g, GE), lambda i, seed: (i, 0)),   # x (packed)
                pl.BlockSpec((GE, GH), lambda i, seed: (0, 0)),       # w1 blkdiag
                pl.BlockSpec((1, GH), lambda i, seed: (0, 0)),        # b1 tiled
                pl.BlockSpec((GH, GE), lambda i, seed: (0, 0)),       # w2 blkdiag
                pl.BlockSpec((1, GE), lambda i, seed: (0, 0)),        # b2 tiled
            ],
            out_specs=pl.BlockSpec((tile_g, GE), lambda i, seed: (i, 0)),
        ),
        compiler_params=pltpu.CompilerParams(
            dimension_semantics=("parallel",)),     # megacore sharding on v7x
    )(seed_arr, xg, w1g, b1g, w2g, b2g)

    return out.reshape(M_pad, E)[:M].reshape(B, T, E)


if __name__ == "__main__":
    key = jax.random.PRNGKey(0)
    k_param, k_input = jax.random.split(key)

    params = init_params(k_param)

    B, T = 2, 8
    x = jax.random.normal(k_input, (B, T, N_EMBED), dtype=jnp.float32)

    # Training-mode run (with dropout).
    y = feed_forward(x, params, seed=0, training=True)
    jax.block_until_ready(y)
    assert y.shape == (B, T, N_EMBED)
    assert bool(jnp.all(jnp.isfinite(y)))

    # Eval-mode (no dropout) must match the plain-JAX reference.
    y_eval = feed_forward(x, params, training=False)
    jax.block_until_ready(y_eval)
    w1, b1, w2, b2 = params
    ref = jnp.maximum(x.reshape(-1, N_EMBED) @ w1 + b1, 0.0) @ w2 + b2
    assert jnp.allclose(y_eval.reshape(-1, N_EMBED), ref, atol=1e-5), "mismatch"

    # Training mode: kept elements equal ref / (1 - p); dropped elements are 0.
    y_flat = y.reshape(-1, N_EMBED)
    kept = y_flat != 0.0
    assert jnp.allclose(jnp.where(kept, y_flat, 0.0),
                        jnp.where(kept, ref * _KEEP_SCALE, 0.0), atol=1e-4)

    print("KERNEL_OK")
</pallas_src>

<mosaic_0001>
module attributes {stable_mosaic.version = 11 : i64} {
  func.func @ffn_kernel(%arg0: i32, %arg1: memref<1xi32, #tpu.memory_space<smem>>, %arg2: memref<8x128xf32, #tpu.memory_space<vmem>>, %arg3: memref<128x512xf32, #tpu.memory_space<vmem>>, %arg4: memref<1x512xf32, #tpu.memory_space<vmem>>, %arg5: memref<512x128xf32, #tpu.memory_space<vmem>>, %arg6: memref<1x128xf32, #tpu.memory_space<vmem>>, %arg7: memref<8x128xf32, #tpu.memory_space<vmem>>) attributes {dimension_semantics = [#tpu.dimension_semantics<parallel>], iteration_bounds = array<i64: 1>, scalar_prefetch = 1 : i64, scratch_operands = 0 : i64, tpu.core_type = #tpu.core_type<tc>, window_params = [{transform_indices = @transform_0, window_bounds = array<i64: 8, 128>}, {pipeline_mode = #tpu.pipeline_mode<synchronous>, transform_indices = @transform_1, window_bounds = array<i64: 128, 512>}, {pipeline_mode = #tpu.pipeline_mode<synchronous>, transform_indices = @transform_2, window_bounds = array<i64: 1, 512>}, {pipeline_mode = #tpu.pipeline_mode<synchronous>, transform_indices = @transform_3, window_bounds = array<i64: 512, 128>}, {pipeline_mode = #tpu.pipeline_mode<synchronous>, transform_indices = @transform_4, window_bounds = array<i64: 1, 128>}, {transform_indices = @transform_5, window_bounds = array<i64: 8, 128>}]} {
    %c0 = arith.constant 0 : index
    %c0_0 = arith.constant 0 : index
    %0 = vector.load %arg2[%c0, %c0_0] : memref<8x128xf32, #tpu.memory_space<vmem>>, vector<8x128xf32>
    %c0_1 = arith.constant 0 : index
    %c0_2 = arith.constant 0 : index
    %1 = vector.load %arg3[%c0_1, %c0_2] : memref<128x512xf32, #tpu.memory_space<vmem>>, vector<128x512xf32>
    %cst = arith.constant dense<0.000000e+00> : vector<8x512xf32>
    %2 = tpu.matmul %0, %1, %cst {dimension_numbers = #tpu.dot_dimension_numbers<[1], [0], [0], [1], [0, 0, 1, 1], [], []>} : vector<8x128xf32>, vector<128x512xf32>, vector<8x512xf32> -> vector<8x512xf32>
    %c0_3 = arith.constant 0 : index
    %c0_4 = arith.constant 0 : index
    %3 = vector.load %arg4[%c0_3, %c0_4] : memref<1x512xf32, #tpu.memory_space<vmem>>, vector<1x512xf32>
    %4 = vector.broadcast %3 : vector<1x512xf32> to vector<8x512xf32>
    %5 = arith.addf %2, %4 : vector<8x512xf32>
    %cst_5 = arith.constant 0.000000e+00 : f32
    %6 = vector.broadcast %cst_5 : f32 to vector<8x512xf32>
    %7 = arith.maximumf %5, %6 : vector<8x512xf32>
    %c0_6 = arith.constant 0 : index
    %c0_7 = arith.constant 0 : index
    %8 = vector.load %arg5[%c0_6, %c0_7] : memref<512x128xf32, #tpu.memory_space<vmem>>, vector<512x128xf32>
    %cst_8 = arith.constant dense<0.000000e+00> : vector<8x128xf32>
    %9 = tpu.matmul %7, %8, %cst_8 {dimension_numbers = #tpu.dot_dimension_numbers<[1], [0], [0], [1], [0, 0, 1, 1], [], []>} : vector<8x512xf32>, vector<512x128xf32>, vector<8x128xf32> -> vector<8x128xf32>
    %c0_9 = arith.constant 0 : index
    %c0_10 = arith.constant 0 : index
    %10 = vector.load %arg6[%c0_9, %c0_10] : memref<1x128xf32, #tpu.memory_space<vmem>>, vector<1x128xf32>
    %11 = vector.broadcast %10 : vector<1x128xf32> to vector<8x128xf32>
    %12 = arith.addf %9, %11 : vector<8x128xf32>
    %c8_i32 = arith.constant 8 : i32
    %13 = arith.muli %arg0, %c8_i32 : i32
    %14 = tpu.iota {dimensions = array<i32: 0>} : vector<8x128xi32>
    %15 = vector.broadcast %13 : i32 to vector<8x128xi32>
    %16 = arith.addi %14, %15 : vector<8x128xi32>
    %17 = tpu.iota {dimensions = array<i32: 1>} : vector<8x128xi32>
    %c128_i32 = arith.constant 128 : i32
    %18 = vector.broadcast %c128_i32 : i32 to vector<8x128xi32>
    %19 = arith.muli %16, %18 : vector<8x128xi32>
    %20 = arith.addi %19, %17 : vector<8x128xi32>
    %c0_11 = arith.constant 0 : index
    %21 = memref.load %arg1[%c0_11] : memref<1xi32, #tpu.memory_space<smem>>
    %c-1640531527_i32 = arith.constant -1640531527 : i32
    %22 = arith.muli %21, %c-1640531527_i32 : i32
    %23 = vector.broadcast %22 : i32 to vector<8x128xi32>
    %24 = arith.xori %20, %23 : vector<8x128xi32>
    %c16_i32 = arith.constant 16 : i32
    %25 = vector.broadcast %c16_i32 : i32 to vector<8x128xi32>
    %26 = arith.shrsi %24, %25 : vector<8x128xi32>
    %c65535_i32 = arith.constant 65535 : i32
    %27 = vector.broadcast %c65535_i32 : i32 to vector<8x128xi32>
    %28 = arith.andi %26, %27 : vector<8x128xi32>
    %29 = arith.xori %24, %28 : vector<8x128xi32>
    %c-2048144789_i32 = arith.constant -2048144789 : i32
    %30 = vector.broadcast %c-2048144789_i32 : i32 to vector<8x128xi32>
    %31 = arith.muli %29, %30 : vector<8x128xi32>
    %c13_i32 = arith.constant 13 : i32
    %32 = vector.broadcast %c13_i32 : i32 to vector<8x128xi32>
    %33 = arith.shrsi %31, %32 : vector<8x128xi32>
    %c524287_i32 = arith.constant 524287 : i32
    %34 = vector.broadcast %c524287_i32 : i32 to vector<8x128xi32>
    %35 = arith.andi %33, %34 : vector<8x128xi32>
    %36 = arith.xori %31, %35 : vector<8x128xi32>
    %c-1028477387_i32 = arith.constant -1028477387 : i32
    %37 = vector.broadcast %c-1028477387_i32 : i32 to vector<8x128xi32>
    %38 = arith.muli %36, %37 : vector<8x128xi32>
    %c16_i32_12 = arith.constant 16 : i32
    %39 = vector.broadcast %c16_i32_12 : i32 to vector<8x128xi32>
    %40 = arith.shrsi %38, %39 : vector<8x128xi32>
    %c65535_i32_13 = arith.constant 65535 : i32
    %41 = vector.broadcast %c65535_i32_13 : i32 to vector<8x128xi32>
    %42 = arith.andi %40, %41 : vector<8x128xi32>
    %43 = arith.xori %38, %42 : vector<8x128xi32>
    %c2147483647_i32 = arith.constant 2147483647 : i32
    %44 = vector.broadcast %c2147483647_i32 : i32 to vector<8x128xi32>
    %45 = arith.andi %43, %44 : vector<8x128xi32>
    %c214748365_i32 = arith.constant 214748365 : i32
    %46 = vector.broadcast %c214748365_i32 : i32 to vector<8x128xi32>
    %47 = arith.cmpi sge, %45, %46 : vector<8x128xi32>
    %cst_14 = arith.constant 1.11111116 : f32
    %48 = vector.broadcast %cst_14 : f32 to vector<8x128xf32>
    %49 = arith.mulf %12, %48 : vector<8x128xf32>
    %cst_15 = arith.constant 0.000000e+00 : f32
    %50 = vector.broadcast %cst_15 : f32 to vector<8x128xf32>
    %51 = arith.select %47, %49, %50 : vector<8x128xi1>, vector<8x128xf32>
    %c0_16 = arith.constant 0 : index
    %c0_17 = arith.constant 0 : index
    %52 = vector.load %arg7[%c0_16, %c0_17] : memref<8x128xf32, #tpu.memory_space<vmem>>, vector<8x128xf32>
    tpu.vector_store %arg7[%c0_16, %c0_17], %51 {strides = array<i32>} : memref<8x128xf32, #tpu.memory_space<vmem>>, vector<8x128xf32>,
    return
  }
  func.func @transform_0(%arg0: i32, %arg1: memref<1xi32, #tpu.memory_space<smem>>) -> (i32, i32) {
    %c0_i32 = arith.constant 0 : i32
    %c0_i32_0 = arith.constant 0 : i32
    return %arg0, %c0_i32 : i32, i32
  }
  func.func @transform_1(%arg0: i32, %arg1: memref<1xi32, #tpu.memory_space<smem>>) -> (i32, i32) {
    %c0_i32 = arith.constant 0 : i32
    %c0_i32_0 = arith.constant 0 : i32
    %c0_i32_1 = arith.constant 0 : i32
    return %c0_i32, %c0_i32_0 : i32, i32
  }
  func.func @transform_2(%arg0: i32, %arg1: memref<1xi32, #tpu.memory_space<smem>>) -> (i32, i32) {
    %c0_i32 = arith.constant 0 : i32
    %c0_i32_0 = arith.constant 0 : i32
    %c0_i32_1 = arith.constant 0 : i32
    return %c0_i32, %c0_i32_0 : i32, i32
  }
  func.func @transform_3(%arg0: i32, %arg1: memref<1xi32, #tpu.memory_space<smem>>) -> (i32, i32) {
    %c0_i32 = arith.constant 0 : i32
    %c0_i32_0 = arith.constant 0 : i32
    %c0_i32_1 = arith.constant 0 : i32
    return %c0_i32, %c0_i32_0 : i32, i32
  }
  func.func @transform_4(%arg0: i32, %arg1: memref<1xi32, #tpu.memory_space<smem>>) -> (i32, i32) {
    %c0_i32 = arith.constant 0 : i32
    %c0_i32_0 = arith.constant 0 : i32
    %c0_i32_1 = arith.constant 0 : i32
    return %c0_i32, %c0_i32_0 : i32, i32
  }
  func.func @transform_5(%arg0: i32, %arg1: memref<1xi32, #tpu.memory_space<smem>>) -> (i32, i32) {
    %c0_i32 = arith.constant 0 : i32
    %c0_i32_0 = arith.constant 0 : i32
    return %arg0, %c0_i32 : i32, i32
  }
}

</mosaic_0001>

<bundles_post_ra>
// kernel: tpu_custom_call.1
= control target key start
LH: loop header
LB: loop body
LE: loop exit
PB: predicated region body
PF: predicated region fallthrough
CT: control target
= control target key end

     0   :  { %12 = vsyncpa [#allocation5], 0  ;;  %s643_s0 = inlined_call_operand.<no memory space> [shape: s32[1], index: 0, kind: input, shape index: {}]   ;;  %s644_s1 = inlined_call_operand.hbm [shape: f32[8,128], index: 1, kind: input, shape index: {}]   ;;  %s645_s2 = inlined_call_operand.hbm [shape: f32[128,512], index: 2, kind: input, shape index: {}]   ;;  %s646_s3 = inlined_call_operand.hbm [shape: f32[1,512], index: 3, kind: input, shape index: {}]   ;;  %s647_s4 = inlined_call_operand.hbm [shape: f32[512,128], index: 4, kind: input, shape index: {}]   ;;  %s648_s5 = inlined_call_operand.vmem [shape: f32[1,128], index: 5, kind: input, shape index: {}]   ;;  %s649_s6 = inlined_call_operand.hbm [shape: f32[8,128], index: 6, kind: output, shape index: {}]  }
   0x1   :  { %13 = vsyncpa [#allocation8], 0 }
   0x2   :  { %14 = vsyncpa [#allocation11], 0  ;;  %s31_s23 = sshll.u32 %s645_s2, 4  ;;  %s32_s23 = int_to_ptr.hbm [resolvable:$true] %s31_s23 }
   0x3   :  { %15 = vsyncpa [#allocation6], 0  ;;  %s578_s24 = smov [#allocation7]   ;;  %s21_s28 = sshll.u32 %s644_s1, 4  ;;  %s22_s28 = int_to_ptr.hbm [resolvable:$true] %s21_s28 }
   0x4   :  { %s33_s25 = sshll.u32 %s578_s24, 4  ;;  %s579_s29 = smov 512   ;;  %s34_s25 = int_to_ptr.vmem [resolvable:$true] %s33_s25 }
   0x5   :  { %s580_s30 = smov 32   ;;  %s581_s7 = smov [#allocation4]  }
   0x6   :  { %39 = dma.hbm_to_vmem [thread:$0]  %s32_s23, 8192, %s34_s25, [#allocation8], %s579_s29, %s579_s29, %s580_s30  }
   0x7   :  { %s23_s8 = sshll.u32 %s581_s7, 4  ;;  %s45_s11 = sshll.u32 %s646_s3, 4  ;;  %s24_s8 = int_to_ptr.vmem [resolvable:$true] %s23_s8  ;;  %s46_s11 = int_to_ptr.hbm [resolvable:$true] %s45_s11 }
   0x8   :  { %26 = dma.hbm_to_vmem [thread:$0]  %s22_s28, 128, %s24_s8, [#allocation5]  }
   0x9   :  { %s55_s13 = sshll.u32 %s647_s4, 4  ;;  %s582_s14 = smov [#allocation9]   ;;  %s56_s13 = int_to_ptr.hbm [resolvable:$true] %s55_s13 }
   0xa   :  { %s47_s15 = sshll.u32 %s582_s14, 4  ;;  %s583_s1 = smov [#allocation10]   ;;  %s48_s15 = int_to_ptr.vmem [resolvable:$true] %s47_s15 }
   0xb   :  { %50 = dma.hbm_to_vmem [thread:$0]  %s46_s11, 64, %s48_s15, [#allocation8]  }
   0xc   :  { %s57_s16 = sshll.u32 %s583_s1, 4  ;;  %s584_s17 = smov 128   ;;  %s58_s16 = int_to_ptr.vmem [resolvable:$true] %s57_s16 }
   0xd   :  { %s585_s18 = smov 8  }
   0xe   :  { %63 = dma.hbm_to_vmem [thread:$0]  %s56_s13, 8192, %s58_s16, [#allocation11], %s584_s17, %s584_s17, %s585_s18  }
   0xf   :  { %570 = dma.done.wait [#allocation5], 128  }
  0x10   :  { %571 = vsyncadd [#allocation5], 4294967168 }
  0x11   :  { %572 = dma.done.wait [#allocation8], 8256  }
  0x12   :  { %573 = vsyncadd [#allocation8], 4294959040 }
  0x13   :  { %574 = dma.done.wait [#allocation11], 8192  }
  0x14   :  { %575 = vsyncadd [#allocation11], 4294959104  ;;  %v145_v0 = vld [vmem:[#allocation7 + $0x1f0] sm:$0xff]  ;;  %v146_v2 = vld [vmem:[#allocation7 + $0x1f8] sm:$0xff]  ;;  %s399_s19 = smul.u32 2654435769, %s643_s0 }
  0x15   :  { %v141_v1 = vld [vmem:[#allocation7 + $0x1d0] sm:$0xff]  ;;  %197 = vmatpush.msra.mxu2 %v145_v0  ;;  %217 = vmatpush.msra.mxu3 %v146_v2  ;;  %v142_v3 = vld [vmem:[#allocation7 + $0x1d8] sm:$0xff]  ;;  %v143_v6 = vld [vmem:[#allocation7 + $0x1e0] sm:$0xff]  ;;  %s586_s0 = smov [#allocation12]   ;;  %s425_s25 = sshll.u32 %s649_s6, 4  ;;  %s426_s25 = int_to_ptr.hbm [resolvable:$true] %s425_s25 }
  0x16   :  { %v137_v4 = vld [vmem:[#allocation7 + $0x1b0] sm:$0xff]  ;;  %v138_v5 = vld [vmem:[#allocation7 + $0x1b8] sm:$0xff]  ;;  %v139_v7 = vld [vmem:[#allocation7 + $0x1c0] sm:$0xff]  ;;  %157 = vmatpush.msra.mxu0 %v143_v6  ;;  %s423_s22 = sshll.u32 %s586_s0, 4  ;;  %s424_s22 = int_to_ptr.vmem [resolvable:$true] %s423_s22 }
  0x17   :  { %198 = vmatpush.msra.mxu2 %v141_v1  ;;  %218 = vmatpush.msra.mxu3 %v142_v3  ;;  %v144_v8 = vld [vmem:[#allocation7 + $0x1e8] sm:$0xff]  ;;  %v133_v9 = vld [vmem:[#allocation7 + $0x190] sm:$0xff]  ;;  %v134_v10 = vld [vmem:[#allocation7 + $0x198] sm:$0xff] }
  0x18   :  { %177 = vmatpush.msra.mxu1 %v144_v8  ;;  %v135_v11 = vld [vmem:[#allocation7 + $0x1a0] sm:$0xff]  ;;  %v140_v12 = vld [vmem:[#allocation7 + $0x1c8] sm:$0xff]  ;;  %v129_v13 = vld [vmem:[#allocation7 + $0x170] sm:$0xff]  ;;  %158 = vmatpush.msra.mxu0 %v139_v7 }
  0x19   :  { %199 = vmatpush.msra.mxu2 %v137_v4  ;;  %219 = vmatpush.msra.mxu3 %v138_v5  ;;  %v130_v14 = vld [vmem:[#allocation7 + $0x178] sm:$0xff]  ;;  %v136_v15 = vld [vmem:[#allocation7 + $0x1a8] sm:$0xff]  ;;  %v131_v16 = vld [vmem:[#allocation7 + $0x180] sm:$0xff] }
  0x1a   :  { %178 = vmatpush.msra.mxu1 %v140_v12  ;;  %v132_v17 = vld [vmem:[#allocation7 + $0x188] sm:$0xff]  ;;  %v125_v18 = vld [vmem:[#allocation7 + $0x150] sm:$0xff]  ;;  %159 = vmatpush.msra.mxu0 %v135_v11  ;;  %v126_v19 = vld [vmem:[#allocation7 + $0x158] sm:$0xff] }
  0x1b   :  { %200 = vmatpush.msra.mxu2 %v133_v9  ;;  %220 = vmatpush.msra.mxu3 %v134_v10  ;;  %v127_v20 = vld [vmem:[#allocation7 + $0x160] sm:$0xff]  ;;  %v128_v21 = vld [vmem:[#allocation7 + $0x168] sm:$0xff]  ;;  %v121_v22 = vld [vmem:[#allocation7 + $0x130] sm:$0xff] }
  0x1c   :  { %179 = vmatpush.msra.mxu1 %v136_v15  ;;  %160 = vmatpush.msra.mxu0 %v131_v16  ;;  %v122_v23 = vld [vmem:[#allocation7 + $0x138] sm:$0xff]  ;;  %v123_v24 = vld [vmem:[#allocation7 + $0x140] sm:$0xff]  ;;  %v124_v25 = vld [vmem:[#allocation7 + $0x148] sm:$0xff] }
  0x1d   :  { %201 = vmatpush.msra.mxu2 %v129_v13  ;;  %221 = vmatpush.msra.mxu3 %v130_v14  ;;  %v117_v26 = vld [vmem:[#allocation7 + $0x110] sm:$0xff]  ;;  %v118_v27 = vld [vmem:[#allocation7 + $0x118] sm:$0xff]  ;;  %v119_v28 = vld [vmem:[#allocation7 + $0x120] sm:$0xff] }
  0x1e   :  { %180 = vmatpush.msra.mxu1 %v132_v17  ;;  %161 = vmatpush.msra.mxu0 %v127_v20  ;;  %v120_v29 = vld [vmem:[#allocation7 + $0x128] sm:$0xff]  ;;  %v113_v30 = vld [vmem:[#allocation7 + $0xf0] sm:$0xff]  ;;  %v114_v31 = vld [vmem:[#allocation7 + $0xf8] sm:$0xff] }
  0x1f   :  { %202 = vmatpush.msra.mxu2 %v125_v18  ;;  %222 = vmatpush.msra.mxu3 %v126_v19  ;;  %v115_v32 = vld [vmem:[#allocation7 + $0x100] sm:$0xff]  ;;  %v116_v33 = vld [vmem:[#allocation7 + $0x108] sm:$0xff]  ;;  %v109_v34 = vld [vmem:[#allocation7 + $0xd0] sm:$0xff] }
  0x20   :  { %181 = vmatpush.msra.mxu1 %v128_v21  ;;  %162 = vmatpush.msra.mxu0 %v123_v24  ;;  %v110_v35 = vld [vmem:[#allocation7 + $0xd8] sm:$0xff]  ;;  %v111_v36 = vld [vmem:[#allocation7 + $0xe0] sm:$0xff]  ;;  %v112_v37 = vld [vmem:[#allocation7 + $0xe8] sm:$0xff] }
  0x21   :  { %203 = vmatpush.msra.mxu2 %v121_v22  ;;  %223 = vmatpush.msra.mxu3 %v122_v23  ;;  %v105_v38 = vld [vmem:[#allocation7 + $0xb0] sm:$0xff]  ;;  %v106_v39 = vld [vmem:[#allocation7 + $0xb8] sm:$0xff]  ;;  %v107_v40 = vld [vmem:[#allocation7 + $0xc0] sm:$0xff] }
  0x22   :  { %182 = vmatpush.msra.mxu1 %v124_v25  ;;  %163 = vmatpush.msra.mxu0 %v119_v28  ;;  %v108_v41 = vld [vmem:[#allocation7 + $0xc8] sm:$0xff]  ;;  %v101_v42 = vld [vmem:[#allocation7 + $0x90] sm:$0xff]  ;;  %v102_v43 = vld [vmem:[#allocation7 + $0x98] sm:$0xff] }
  0x23   :  { %204 = vmatpush.msra.mxu2 %v117_v26  ;;  %224 = vmatpush.msra.mxu3 %v118_v27  ;;  %v103_v44 = vld [vmem:[#allocation7 + $0xa0] sm:$0xff]  ;;  %v104_v45 = vld [vmem:[#allocation7 + $0xa8] sm:$0xff]  ;;  %v97_v46 = vld [vmem:[#allocation7 + $0x70] sm:$0xff] }
  0x24   :  { %183 = vmatpush.msra.mxu1 %v120_v29  ;;  %164 = vmatpush.msra.mxu0 %v115_v32  ;;  %v98_v47 = vld [vmem:[#allocation7 + $0x78] sm:$0xff]  ;;  %v99_v48 = vld [vmem:[#allocation7 + $0x80] sm:$0xff]  ;;  %v100_v49 = vld [vmem:[#allocation7 + $0x88] sm:$0xff] }
  0x25   :  { %205 = vmatpush.msra.mxu2 %v113_v30  ;;  %225 = vmatpush.msra.mxu3 %v114_v31  ;;  %v93_v50 = vld [vmem:[#allocation7 + $0x50] sm:$0xff]  ;;  %v94_v51 = vld [vmem:[#allocation7 + $0x58] sm:$0xff]  ;;  %v95_v52 = vld [vmem:[#allocation7 + $0x60] sm:$0xff] }
  0x26   :  { %184 = vmatpush.msra.mxu1 %v116_v33  ;;  %165 = vmatpush.msra.mxu0 %v111_v36  ;;  %v96_v53 = vld [vmem:[#allocation7 + $0x68] sm:$0xff]  ;;  %v89_v54 = vld [vmem:[#allocation7 + $0x30] sm:$0xff]  ;;  %v90_v55 = vld [vmem:[#allocation7 + $0x38] sm:$0xff] }
  0x27   :  { %206 = vmatpush.msra.mxu2 %v109_v34  ;;  %226 = vmatpush.msra.mxu3 %v110_v35  ;;  %v91_v56 = vld [vmem:[#allocation7 + $0x40] sm:$0xff]  ;;  %v92_v57 = vld [vmem:[#allocation7 + $0x48] sm:$0xff]  ;;  %v85_v58 = vld [vmem:[#allocation7 + $0x10] sm:$0xff] }
  0x28   :  { %185 = vmatpush.msra.mxu1 %v112_v37  ;;  %166 = vmatpush.msra.mxu0 %v107_v40  ;;  %v86_v59 = vld [vmem:[#allocation7 + $0x18] sm:$0xff]  ;;  %v87_v61 = vld [vmem:[#allocation7 + $0x20] sm:$0xff]  ;;  %v88_v62 = vld [vmem:[#allocation7 + $0x28] sm:$0xff] }
  0x29   :  { %207 = vmatpush.msra.mxu2 %v105_v38  ;;  %227 = vmatpush.msra.mxu3 %v106_v39  ;;  %v82_v60 = vld [vmem:[#allocation4] sm:$0xff]  ;;  %v83_v1 = vld [vmem:[#allocation7] sm:$0xff]  ;;  %v84_v2 = vld [vmem:[#allocation7 + $0x8] sm:$0xff] }
  0x2a   :  { %186 = vmatpush.msra.mxu1 %v108_v41  ;;  %167 = vmatpush.msra.mxu0 %v103_v44  ;;  %v288_v63 = vld [vmem:[#allocation10 + $0x178] sm:$0xff]  ;;  %v287_v4 = vld [vmem:[#allocation10 + $0x170] sm:$0xff]  ;;  %v286_v8 = vld [vmem:[#allocation10 + $0x168] sm:$0xff] }
  0x2b   :  { %208 = vmatpush.msra.mxu2 %v101_v42  ;;  %228 = vmatpush.msra.mxu3 %v102_v43  ;;  %v304_v0 = vld [vmem:[#allocation10 + $0x1f8] sm:$0xff]  ;;  %v303_v6 = vld [vmem:[#allocation10 + $0x1f0] sm:$0xff]  ;;  %v302_v10 = vld [vmem:[#allocation10 + $0x1e8] sm:$0xff] }
  0x2c   :  { %187 = vmatpush.msra.mxu1 %v104_v45  ;;  %168 = vmatpush.msra.mxu0 %v99_v48  ;;  %v256_v3 = vld [vmem:[#allocation10 + $0x78] sm:$0xff]  ;;  %v255_v7 = vld [vmem:[#allocation10 + $0x70] sm:$0xff]  ;;  %v254_v11 = vld [vmem:[#allocation10 + $0x68] sm:$0xff] }
  0x2d   :  { %209 = vmatpush.msra.mxu2 %v97_v46  ;;  %229 = vmatpush.msra.mxu3 %v98_v47  ;;  %v272_v5 = vld [vmem:[#allocation10 + $0xf8] sm:$0xff]  ;;  %v271_v9 = vld [vmem:[#allocation10 + $0xf0] sm:$0xff]  ;;  %v285_v12 = vld [vmem:[#allocation10 + $0x160] sm:$0xff] }
  0x2e   :  { %188 = vmatpush.msra.mxu1 %v100_v49  ;;  %169 = vmatpush.msra.mxu0 %v95_v52  ;;  %v270_v13 = vld [vmem:[#allocation10 + $0xe8] sm:$0xff]  ;;  %v301_v14 = vld [vmem:[#allocation10 + $0x1e0] sm:$0xff]  ;;  %v284_v16 = vld [vmem:[#allocation10 + $0x158] sm:$0xff] }
  0x2f   :  { %210 = vmatpush.msra.mxu2 %v93_v50  ;;  %230 = vmatpush.msra.mxu3 %v94_v51  ;;  %v253_v15 = vld [vmem:[#allocation10 + $0x60] sm:$0xff]  ;;  %v300_v18 = vld [vmem:[#allocation10 + $0x1d8] sm:$0xff]  ;;  %v283_v20 = vld [vmem:[#allocation10 + $0x150] sm:$0xff] }
  0x30   :  { %189 = vmatpush.msra.mxu1 %v96_v53  ;;  %170 = vmatpush.msra.mxu0 %v91_v56  ;;  %v269_v17 = vld [vmem:[#allocation10 + $0xe0] sm:$0xff]  ;;  %v252_v19 = vld [vmem:[#allocation10 + $0x58] sm:$0xff]  ;;  %v299_v22 = vld [vmem:[#allocation10 + $0x1d0] sm:$0xff] }
  0x31   :  { %211 = vmatpush.msra.mxu2 %v89_v54  ;;  %231 = vmatpush.msra.mxu3 %v90_v55  ;;  %v268_v21 = vld [vmem:[#allocation10 + $0xd8] sm:$0xff]  ;;  %v251_v23 = vld [vmem:[#allocation10 + $0x50] sm:$0xff]  ;;  %v282_v24 = vld [vmem:[#allocation10 + $0x148] sm:$0xff] }
  0x32   :  { %190 = vmatpush.msra.mxu1 %v92_v57  ;;  %171 = vmatpush.msra.mxu0 %v87_v61  ;;  %v267_v25 = vld [vmem:[#allocation10 + $0xd0] sm:$0xff]  ;;  %v298_v26 = vld [vmem:[#allocation10 + $0x1c8] sm:$0xff]  ;;  %v281_v28 = vld [vmem:[#allocation10 + $0x140] sm:$0xff] }
  0x33   :  { %212 = vmatpush.msra.mxu2 %v85_v58  ;;  %232 = vmatpush.msra.mxu3 %v86_v59  ;;  %v250_v27 = vld [vmem:[#allocation10 + $0x48] sm:$0xff]  ;;  %v297_v30 = vld [vmem:[#allocation10 + $0x1c0] sm:$0xff]  ;;  %v280_v32 = vld [vmem:[#allocation10 + $0x138] sm:$0xff] }
  0x34   :  { %213 = vmatmul.f32.vlgmr.msra.gmra.mxu2 %v82_v60  ;;  %233 = vmatmul.f32.vlgmr.msra.gmra.mxu3 %v82_v60  ;;  %v266_v29 = vld [vmem:[#allocation10 + $0xc8] sm:$0xff]  ;;  %v249_v31 = vld [vmem:[#allocation10 + $0x40] sm:$0xff]  ;;  %v296_v34 = vld [vmem:[#allocation10 + $0x1b8] sm:$0xff] }
  0x35   :  { %191 = vmatpush.msra.mxu1 %v88_v62  ;;  %349 = vmatpush.msrb.mxu2 %v288_v63  ;;  %v265_v33 = vld [vmem:[#allocation10 + $0xc0] sm:$0xff]  ;;  %v248_v35 = vld [vmem:[#allocation10 + $0x38] sm:$0xff]  ;;  %v279_v36 = vld [vmem:[#allocation10 + $0x130] sm:$0xff] }
  0x36   :  { %369 = vmatpush.msrb.mxu3 %v304_v0  ;;  %172 = vmatpush.msra.mxu0 %v83_v1  ;;  %v264_v37 = vld [vmem:[#allocation10 + $0xb8] sm:$0xff]  ;;  %v295_v38 = vld [vmem:[#allocation10 + $0x1b0] sm:$0xff]  ;;  %v278_v40 = vld [vmem:[#allocation10 + $0x128] sm:$0xff] }
  0x37   :  { %192 = vmatpush.msra.mxu1 %v84_v2  ;;  %173 = vmatmul.f32.vlgmr.msra.gmra.mxu0 %v82_v60  ;;  %v247_v39 = vld [vmem:[#allocation10 + $0x30] sm:$0xff]  ;;  %v294_v42 = vld [vmem:[#allocation10 + $0x1a8] sm:$0xff]  ;;  %v277_v44 = vld [vmem:[#allocation10 + $0x120] sm:$0xff] }
  0x38   :  { %193 = vmatmul.f32.vlgmr.msra.gmra.mxu1 %v82_v60  ;;  %309 = vmatpush.msrb.mxu0 %v256_v3  ;;  %v263_v41 = vld [vmem:[#allocation10 + $0xb0] sm:$0xff]  ;;  %v246_v43 = vld [vmem:[#allocation10 + $0x28] sm:$0xff]  ;;  %v293_v46 = vld [vmem:[#allocation10 + $0x1a0] sm:$0xff] }
  0x39   :  { %350 = vmatpush.msrb.mxu2 %v287_v4  ;;  %329 = vmatpush.msrb.mxu1 %v272_v5  ;;  %v262_v45 = vld [vmem:[#allocation10 + $0xa8] sm:$0xff]  ;;  %v245_v47 = vld [vmem:[#allocation10 + $0x20] sm:$0xff]  ;;  %v276_v48 = vld [vmem:[#allocation10 + $0x118] sm:$0xff] }
  0x3a   :  { %370 = vmatpush.msrb.mxu3 %v303_v6  ;;  %310 = vmatpush.msrb.mxu0 %v255_v7  ;;  %v244_v49 = vld [vmem:[#allocation10 + $0x18] sm:$0xff]  ;;  %v261_v50 = vld [vmem:[#allocation10 + $0xa0] sm:$0xff]  ;;  %v275_v51 = vld [vmem:[#allocation10 + $0x110] sm:$0xff] }
  0x3b   :  { %351 = vmatpush.msrb.mxu2 %v286_v8  ;;  %330 = vmatpush.msrb.mxu1 %v271_v9  ;;  %v292_v52 = vld [vmem:[#allocation10 + $0x198] sm:$0xff]  ;;  %v243_v53 = vld [vmem:[#allocation10 + $0x10] sm:$0xff]  ;;  %v274_v55 = vld [vmem:[#allocation10 + $0x108] sm:$0xff] }
  0x3c   :  { %371 = vmatpush.msrb.mxu3 %v302_v10  ;;  %311 = vmatpush.msrb.mxu0 %v254_v11  ;;  %v260_v54 = vld [vmem:[#allocation10 + $0x98] sm:$0xff]  ;;  %v291_v56 = vld [vmem:[#allocation10 + $0x190] sm:$0xff]  ;;  %v242_v57 = vld [vmem:[#allocation10 + $0x8] sm:$0xff] }
  0x3d   :  { %352 = vmatpush.msrb.mxu2 %v285_v12  ;;  %331 = vmatpush.msrb.mxu1 %v270_v13  ;;  %v259_v58 = vld [vmem:[#allocation10 + $0x90] sm:$0xff]  ;;  %v273_v59 = vld [vmem:[#allocation10 + $0x100] sm:$0xff]  ;;  %v290_v60 = vld [vmem:[#allocation10 + $0x188] sm:$0xff] }
  0x3e   :  { %372 = vmatpush.msrb.mxu3 %v301_v14  ;;  %312 = vmatpush.msrb.mxu0 %v253_v15  ;;  %v241_v61 = vld [vmem:[#allocation10] sm:$0xff]  ;;  %v258_v62 = vld [vmem:[#allocation10 + $0x88] sm:$0xff]  ;;  %v147_v1 = vld [vmem:[#allocation9] sm:$0xf] }
  0x3f   :  { %353 = vmatpush.msrb.mxu2 %v284_v16  ;;  %332 = vmatpush.msrb.mxu1 %v269_v17  ;;  %v289_v63 = vld [vmem:[#allocation10 + $0x180] sm:$0xff]  ;;  %v149_v2 = vperm.slane %v147_v1, 0  ;;  %v150_v3 = vperm.slane %v147_v1, 1  ;;  %v151_v4 = vperm.slane %v147_v1, 2  ;;  %v152_v5 = vperm.slane %v147_v1, 3 }
  0x40   :  { %373 = vmatpush.msrb.mxu3 %v300_v18  ;;  %313 = vmatpush.msrb.mxu0 %v252_v19  ;;  %v257_v0 = vld [vmem:[#allocation10 + $0x80] sm:$0xff]  ;;  %v390_v18 = vlaneseq }
  0x41   :  { %354 = vmatpush.msrb.mxu2 %v283_v20  ;;  %333 = vmatpush.msrb.mxu1 %v268_v21 }
  0x42   :  { %374 = vmatpush.msrb.mxu3 %v299_v22  ;;  %314 = vmatpush.msrb.mxu0 %v251_v23  ;;  %v391_v19 = vshrl.u32 %v390_v18, 7  ;;  %v395_v20 = vand.u32 127, %v390_v18  ;;  %v400_v23 = vstv %s399_s19 }
  0x43   :  { %355 = vmatpush.msrb.mxu2 %v282_v24  ;;  %334 = vmatpush.msrb.mxu1 %v267_v25 }
  0x44   :  { %375 = vmatpush.msrb.mxu3 %v298_v26  ;;  %315 = vmatpush.msrb.mxu0 %v250_v27  ;;  %v396_v21 = vmul.u32 128, %v391_v19 }
  0x45   :  { %356 = vmatpush.msrb.mxu2 %v281_v28  ;;  %335 = vmatpush.msrb.mxu1 %v266_v29 }
  0x46   :  { %376 = vmatpush.msrb.mxu3 %v297_v30  ;;  %316 = vmatpush.msrb.mxu0 %v249_v31  ;;  %v397_v22 = vadd.s32 %v396_v21, %v395_v20  ;;  %v449_v31 = vld [vmem:[%s648_s5] ss:$0 sm:$0xff] }
  0x47   :  { %357 = vmatpush.msrb.mxu2 %v280_v32  ;;  %336 = vmatpush.msrb.mxu1 %v265_v33 }
  0x48   :  { %377 = vmatpush.msrb.mxu3 %v296_v34  ;;  %317 = vmatpush.msrb.mxu0 %v248_v35  ;;  %v401_v24 = vxor.u32 %v400_v23, %v397_v22 }
  0x49   :  { %358 = vmatpush.msrb.mxu2 %v279_v36  ;;  %337 = vmatpush.msrb.mxu1 %v264_v37 }
  0x4a   :  { %378 = vmatpush.msrb.mxu3 %v295_v38  ;;  %318 = vmatpush.msrb.mxu0 %v247_v39  ;;  %v437_v25 = vshrl.u32 %v401_v24, 16 }
  0x4b   :  { %359 = vmatpush.msrb.mxu2 %v278_v40  ;;  %338 = vmatpush.msrb.mxu1 %v263_v41 }
  0x4c   :  { %379 = vmatpush.msrb.mxu3 %v294_v42  ;;  %319 = vmatpush.msrb.mxu0 %v246_v43  ;;  %v404_v26 = vxor.u32 %v437_v25, %v401_v24 }
  0x4d   :  { %360 = vmatpush.msrb.mxu2 %v277_v44  ;;  %339 = vmatpush.msrb.mxu1 %v262_v45 }
  0x4e   :  { %380 = vmatpush.msrb.mxu3 %v293_v46  ;;  %320 = vmatpush.msrb.mxu0 %v245_v47  ;;  %v405_v27 = vmul.u32 2246822507, %v404_v26 }
  0x4f   :  { %361 = vmatpush.msrb.mxu2 %v276_v48  ;;  %340 = vmatpush.msrb.mxu1 %v261_v50 }
  0x50   :  { %321 = vmatpush.msrb.mxu0 %v244_v49  ;;  %381 = vmatpush.msrb.mxu3 %v292_v52  ;;  %v438_v28 = vshrl.u32 %v405_v27, 13 }
  0x51   :  { %362 = vmatpush.msrb.mxu2 %v275_v51  ;;  %341 = vmatpush.msrb.mxu1 %v260_v54 }
  0x52   :  { %322 = vmatpush.msrb.mxu0 %v243_v53  ;;  %382 = vmatpush.msrb.mxu3 %v291_v56  ;;  %v408_v29 = vxor.u32 %v438_v28, %v405_v27 }
  0x53   :  { %363 = vmatpush.msrb.mxu2 %v274_v55  ;;  %342 = vmatpush.msrb.mxu1 %v259_v58 }
  0x54   :  { %323 = vmatpush.msrb.mxu0 %v242_v57  ;;  %383 = vmatpush.msrb.mxu3 %v290_v60  ;;  %v409_v30 = vmul.u32 3266489909, %v408_v29 }
  0x55   :  { %364 = vmatpush.msrb.mxu2 %v273_v59  ;;  %343 = vmatpush.msrb.mxu1 %v258_v62 }
  0x56   :  { %324 = vmatpush.msrb.mxu0 %v241_v61  ;;  %384 = vmatpush.msrb.mxu3 %v289_v63  ;;  %v439_v33 = vshrl.u32 %v409_v30, 16 }
  0x57   :  { %344 = vmatpush.msrb.mxu1 %v257_v0 }
  0x58   :  { %v412_v36 = vxor.u32 %v439_v33, %v409_v30 }
  0x5a   :  { %v413_v40 = vand.u32 2147483647, %v412_v36 }
  0x5c   :  { %vm414_vm0 = vcmp.ge.s32.totalorder %v413_v40, 214748365 }
  0xb4   :  { %v174_v6 = vpop.f32.mrf.mxu0 }
  0xb5   :  { %v194_v7 = vpop.f32.mrf.mxu1  ;;  %v175_v8 = vadd.f32 %v174_v6, %v149_v2 }
  0xb6   :  { %v195_v9 = vadd.f32 %v194_v7, %v150_v3 }
  0xb7   :  { %v214_v10 = vpop.f32.mrf.mxu2  ;;  %v234_v11 = vpop.f32.mrf.mxu3  ;;  %v237_v13 = vmax.f32 %v175_v8, 0.0 }
  0xb8   :  { %v215_v12 = vadd.f32 %v214_v10, %v151_v4  ;;  %v235_v14 = vadd.f32 %v234_v11, %v152_v5  ;;  %v238_v15 = vmax.f32 %v195_v9, 0.0 }
  0xb9   :  { %325 = vmatmul.f32.vlgmr.msrb.gmra.mxu0 %v237_v13 }
  0xba   :  { %v239_v16 = vmax.f32 %v215_v12, 0.0  ;;  %v240_v17 = vmax.f32 %v235_v14, 0.0  ;;  %345 = vmatmul.f32.vlgmr.msrb.gmra.mxu1 %v238_v15 }
  0xbc   :  { %365 = vmatmul.f32.vlgmr.msrb.gmra.mxu2 %v239_v16  ;;  %385 = vmatmul.f32.vlgmr.msrb.gmra.mxu3 %v240_v17 }
 0x136   :  { %v326_v32 = vpop.f32.mrf.mxu0 }
 0x137   :  { %v327_v34 = vadd.f32 %v449_v31, %v326_v32  ;;  %v346_v35 = vpop.f32.mrf.mxu1 }
 0x139   :  { %v347_v37 = vadd.f32 %v346_v35, %v327_v34 }
 0x13f   :  { %v366_v38 = vpop.f32.mrf.mxu2  ;;  %v386_v39 = vpop.f32.mrf.mxu3 }
 0x140   :  { %v367_v41 = vadd.f32 %v366_v38, %v347_v37 }
 0x142   :  { %v387_v42 = vadd.f32 %v386_v39, %v367_v41 }
 0x144   :  { %v415_v43 = vmul.f32 1.1111112, %v387_v42 }
 0x146   :  { %v416_v44 = vsel %vm414_vm0, %v415_v43, 0.0 }
 0x147   :  { %417 = vst [vmem:[#allocation12] sm:$0xff] %v416_v44 }
 0x148   :  { %428 = dma.vmem_to_hbm [thread:$0]  %s424_s22, 128, %s426_s25, [#allocation6]  }
 0x149   :  { %576 = dma.done.wait [#allocation6], 128  }
 0x14a   :  { %577 = vsyncadd [#allocation6], 4294967168 }
 0x14b   :  { %433 = vsyncpa [#allocation5], 1 }
 0x14c   :  { %434 = vsyncpa [#allocation8], 1 }
 0x14d   :  { %435 = vsyncpa [#allocation11], 1 }
 0x14e   :  { %436 = vsyncpa [#allocation6], 1 }

</bundles_post_ra>
